<compile_context>
chip_gen: v7x
topology: tpu7x:2x2x1
jax: 0.10.0
libtpu: 0.0.40
codegen_flags: <defaults>
</compile_context>

<pallas_src>
import math

import jax
import jax.numpy as jnp
from jax.experimental import pallas as pl
from jax.experimental.pallas import tpu as pltpu

_LANE = 128          # lane width: every feature dim padded to a multiple of this
_SUB_BF16 = 16       # sublane granularity for the bf16 batch tile
_VMEM_BUDGET = 12 * 1024 * 1024   # per-step working-set target (fits all chips)
_MAX_BATCH_TILE = 2048


def _round_up(x, m):
    return ((x + m - 1) // m) * m


# ----------------------------- Pallas kernel -------------------------------

def _ae_kernel(x_ref, w_ref, b_ref, o_ref):
    """Fused encoder+decoder MLP forward for one (lane-padded) batch tile.

    x_ref : (tile, P)           bfloat16   input block
    w_ref : (P, n_layers * P)   bfloat16   all 8 layer weights, concatenated
    b_ref : (n_layers, P)       float32    all 8 layer biases
    o_ref : (tile, P)           float32    output block
    """
    n_layers = b_ref.shape[0]
    P = x_ref.shape[1]

    h = x_ref[...]                                   # bf16 activations
    for li in range(n_layers):
        w = w_ref[:, li * P:(li + 1) * P]            # (P, P) bf16, static slice
        b = b_ref[li:li + 1, :]                      # (1, P) f32
        # bf16 into the MXU, f32 accumulation.
        z = jnp.dot(h, w, preferred_element_type=jnp.float32) + b
        # Layer 3 = last encoder layer, layer 7 = last decoder layer -> Tanh,
        # everything else ReLU (matches AutoEncoder.build_layer).
        is_tanh = (li == n_layers // 2 - 1) or (li == n_layers - 1)
        a = jnp.tanh(z) if is_tanh else jnp.maximum(z, 0.0)
        if li == n_layers - 1:
            o_ref[...] = a.astype(o_ref.dtype)       # final tanh stored in f32
        else:
            h = a.astype(jnp.bfloat16)               # fused activation + downcast


# ----------------------------- host wrapper --------------------------------

def _pack_params(params, P):
    """Pad every layer to (P, P)/(P,) and concatenate into two slabs."""
    n_layers = len(params) // 2
    w_cols, b_rows = [], []
    for li in range(n_layers):
        w, b = params[2 * li], params[2 * li + 1]
        m, n = w.shape
        wp = jnp.pad(w.astype(jnp.bfloat16), ((0, P - m), (0, P - n)))
        bp = jnp.pad(b.astype(jnp.float32).reshape(1, -1), ((0, 0), (0, P - n)))
        w_cols.append(wp)
        b_rows.append(bp)
    w_slab = jnp.concatenate(w_cols, axis=1)   # (P, n_layers*P) bf16
    b_slab = jnp.concatenate(b_rows, axis=0)   # (n_layers, P)   f32
    return w_slab, b_slab


def _pick_batch_tiling(B, P, resident_param_bytes):
    """Pick (tile, Bp, n_tiles) from the real batch size and a VMEM budget."""
    # Per-row VMEM: bf16 in block (x2 buffers) + f32 out block (x2) + f32 acc
    # + bf16 activation.
    per_row = P * 2 * 2 + P * 4 * 2 + P * 6
    budget = max(_VMEM_BUDGET - 2 * resident_param_bytes, per_row * _SUB_BF16)
    cap = (budget // per_row) // _SUB_BF16 * _SUB_BF16
    cap = max(_SUB_BF16, min(_MAX_BATCH_TILE, cap))

    n_tiles = max(1, -(-B // cap))
    # At least 2 grid steps for reasonably sized batches so 2-TC chips (v7x)
    # shard the ("parallel",) grid across both TensorCores.
    if n_tiles == 1 and B >= 8 * _SUB_BF16:
        n_tiles = 2
    tile = _round_up(max(1, -(-B // n_tiles)), _SUB_BF16)
    Bp = tile * n_tiles
    return tile, Bp, n_tiles


def autoencoder_forward(x, params):
    """Fused autoencoder forward.

    x:      (B, D) float32
    params: flat list [w0, b0, ..., w7, b7]; w_i is (in_i, out_i) float32
            (already transposed from PyTorch's (out, in)), b_i is (1, out_i).
    """
    B, D = x.shape
    n_layers = len(params) // 2

    # Common lane-dense feature width: every dim padded to the same multiple
    # of 128 so weights can be concatenated into one slab.
    dims = [D] + [params[2 * li].shape[1] for li in range(n_layers)]
    P = _round_up(max(dims), _LANE)

    w_slab, b_slab = _pack_params(params, P)
    param_bytes = w_slab.size * 2 + b_slab.size * 4

    tile, Bp, n_tiles = _pick_batch_tiling(B, P, param_bytes)

    # Input streamed as bf16 (identical math: the kernel fed bf16 to the MXU
    # anyway), padded batch rows / feature lanes are zeros.
    xp = jnp.pad(x.astype(jnp.bfloat16), ((0, Bp - B), (0, P - D)))

    cost = pl.CostEstimate(
        flops=int(2 * P * P * n_layers * Bp),
        transcendentals=int(2 * P * Bp),           # two tanh layers of width P
        bytes_accessed=int(Bp * P * 2 + Bp * P * 4 + param_bytes),
    )

    out_padded = pl.pallas_call(
        _ae_kernel,
        out_shape=jax.ShapeDtypeStruct((Bp, P), jnp.float32),
        grid_spec=pltpu.PrefetchScalarGridSpec(
            num_scalar_prefetch=0,
            grid=(n_tiles,),
            in_specs=[
                pl.BlockSpec((tile, P), lambda i: (i, 0)),       # x (bf16)
                pl.BlockSpec(w_slab.shape, lambda i: (0, 0)),    # weights, resident
                pl.BlockSpec(b_slab.shape, lambda i: (0, 0)),    # biases, resident
            ],
            out_specs=pl.BlockSpec((tile, P), lambda i: (i, 0)), # lane-dense out
        ),
        compiler_params=pltpu.CompilerParams(
            dimension_semantics=("parallel",),
        ),
        cost_estimate=cost,
    )(xp, w_slab, b_slab)

    return out_padded[:B, :D]


# --------------------------- parameter init --------------------------------

def _kaiming_normal_fan_out(key, in_dim, out_dim):
    # kaiming_normal_(mode='fan_out', 'relu') on a (out, in) weight:
    # std = sqrt(2 / fan_out) = sqrt(2 / out_dim).
    std = math.sqrt(2.0 / out_dim)
    return jax.random.normal(key, (in_dim, out_dim), jnp.float32) * std


def _xavier_normal(key, in_dim, out_dim, gain=0.5):
    std = gain * math.sqrt(2.0 / (in_dim + out_dim))
    return jax.random.normal(key, (in_dim, out_dim), jnp.float32) * std


def _bias_init(key, in_dim, out_dim):
    # PyTorch Linear default bias init: U(-1/sqrt(fan_in), 1/sqrt(fan_in)).
    bound = 1.0 / math.sqrt(in_dim)
    return jax.random.uniform(key, (1, out_dim), jnp.float32, -bound, bound)


def make_params(key, input_dim, hidden_dims, latent_dim):
    enc_sizes = [input_dim] + hidden_dims + [latent_dim]
    dec_sizes = [latent_dim] + hidden_dims[::-1] + [input_dim]

    params = []
    for sizes in (enc_sizes, dec_sizes):
        pairs = list(zip(sizes[:-1], sizes[1:]))
        for li, (m, n) in enumerate(pairs):
            key, kw, kb = jax.random.split(key, 3)
            if li != len(pairs) - 1:
                w = _kaiming_normal_fan_out(kw, m, n)
            else:
                w = _xavier_normal(kw, m, n, gain=0.5)
            b = _bias_init(kb, m, n)
            params.append(w)
            params.append(b)
    return params


# pure-JAX f32 reference for the sanity check
def _reference_forward(x, params):
    n_layers = len(params) // 2
    h = x
    for li in range(n_layers):
        w, b = params[2 * li], params[2 * li + 1]
        h = h @ w + b
        if li == n_layers // 2 - 1 or li == n_layers - 1:
            h = jnp.tanh(h)
        else:
            h = jnp.maximum(h, 0.0)
    return h


# TODO(synk): training loop (Adam/MSELoss in fit_transform/_train) and the
# numpy spike_scaling helper are host-side machinery, not part of the forward
# pass, and are not translated.

if __name__ == "__main__":
    input_dim = 64
    hidden_dims = [128, 64, 32]
    latent_dim = 2
    batch = 16

    key = jax.random.PRNGKey(0)
    key, kx, kp = jax.random.split(key, 3)

    x = jax.random.normal(kx, (batch, input_dim), jnp.float32)
    params = make_params(kp, input_dim, hidden_dims, latent_dim)

    out = autoencoder_forward(x, params)
    out = jax.block_until_ready(out)

    ref = _reference_forward(x, params)
    assert out.shape == (batch, input_dim)
    assert out.dtype == jnp.float32
    # bf16 MXU inputs/activations with f32 accumulation: loosen tolerance vs
    # the f32 reference (outputs are tanh-bounded, so 5e-2 is a wide margin).
    assert jnp.allclose(out, ref, atol=5e-2, rtol=5e-2)

    print("KERNEL_OK")
</pallas_src>

<mosaic_0001>
module attributes {stable_mosaic.version = 11 : i64} {
  func.func @_ae_kernel(%arg0: i32, %arg1: memref<16x128xbf16, #tpu.memory_space<vmem>>, %arg2: memref<128x1024xbf16, #tpu.memory_space<vmem>>, %arg3: memref<8x128xf32, #tpu.memory_space<vmem>>, %arg4: memref<16x128xf32, #tpu.memory_space<vmem>>) attributes {dimension_semantics = [#tpu.dimension_semantics<parallel>], iteration_bounds = array<i64: 1>, scalar_prefetch = 0 : i64, scratch_operands = 0 : i64, tpu.core_type = #tpu.core_type<tc>, window_params = [{transform_indices = @transform_0, window_bounds = array<i64: 16, 128>}, {pipeline_mode = #tpu.pipeline_mode<synchronous>, transform_indices = @transform_1, window_bounds = array<i64: 128, 1024>}, {pipeline_mode = #tpu.pipeline_mode<synchronous>, transform_indices = @transform_2, window_bounds = array<i64: 8, 128>}, {transform_indices = @transform_3, window_bounds = array<i64: 16, 128>}]} {
    %c0 = arith.constant 0 : index
    %c0_0 = arith.constant 0 : index
    %0 = vector.load %arg1[%c0, %c0_0] : memref<16x128xbf16, #tpu.memory_space<vmem>>, vector<16x128xbf16>
    %c0_1 = arith.constant 0 : index
    %c0_2 = arith.constant 0 : index
    %1 = vector.load %arg2[%c0_1, %c0_2] : memref<128x1024xbf16, #tpu.memory_space<vmem>>, vector<128x128xbf16>
    %c0_3 = arith.constant 0 : index
    %c0_4 = arith.constant 0 : index
    %2 = vector.load %arg3[%c0_3, %c0_4] : memref<8x128xf32, #tpu.memory_space<vmem>>, vector<1x128xf32>
    %cst = arith.constant dense<0.000000e+00> : vector<16x128xf32>
    %3 = tpu.matmul %0, %1, %cst {dimension_numbers = #tpu.dot_dimension_numbers<[1], [0], [0], [1], [0, 0, 1, 1], [], []>} : vector<16x128xbf16>, vector<128x128xbf16>, vector<16x128xf32> -> vector<16x128xf32>
    %4 = vector.broadcast %2 : vector<1x128xf32> to vector<16x128xf32>
    %5 = arith.addf %3, %4 : vector<16x128xf32>
    %cst_5 = arith.constant 0.000000e+00 : f32
    %6 = vector.broadcast %cst_5 : f32 to vector<16x128xf32>
    %7 = arith.maximumf %5, %6 : vector<16x128xf32>
    %8 = arith.truncf %7 : vector<16x128xf32> to vector<16x128xbf16>
    %c0_6 = arith.constant 0 : index
    %c128 = arith.constant 128 : index
    %9 = vector.load %arg2[%c0_6, %c128] : memref<128x1024xbf16, #tpu.memory_space<vmem>>, vector<128x128xbf16>
    %c1 = arith.constant 1 : index
    %c0_7 = arith.constant 0 : index
    %10 = vector.load %arg3[%c1, %c0_7] : memref<8x128xf32, #tpu.memory_space<vmem>>, vector<1x128xf32>
    %cst_8 = arith.constant dense<0.000000e+00> : vector<16x128xf32>
    %11 = tpu.matmul %8, %9, %cst_8 {dimension_numbers = #tpu.dot_dimension_numbers<[1], [0], [0], [1], [0, 0, 1, 1], [], []>} : vector<16x128xbf16>, vector<128x128xbf16>, vector<16x128xf32> -> vector<16x128xf32>
    %12 = vector.broadcast %10 : vector<1x128xf32> to vector<16x128xf32>
    %13 = arith.addf %11, %12 : vector<16x128xf32>
    %cst_9 = arith.constant 0.000000e+00 : f32
    %14 = vector.broadcast %cst_9 : f32 to vector<16x128xf32>
    %15 = arith.maximumf %13, %14 : vector<16x128xf32>
    %16 = arith.truncf %15 : vector<16x128xf32> to vector<16x128xbf16>
    %c0_10 = arith.constant 0 : index
    %c256 = arith.constant 256 : index
    %17 = vector.load %arg2[%c0_10, %c256] : memref<128x1024xbf16, #tpu.memory_space<vmem>>, vector<128x128xbf16>
    %c2 = arith.constant 2 : index
    %c0_11 = arith.constant 0 : index
    %18 = vector.load %arg3[%c2, %c0_11] : memref<8x128xf32, #tpu.memory_space<vmem>>, vector<1x128xf32>
    %cst_12 = arith.constant dense<0.000000e+00> : vector<16x128xf32>
    %19 = tpu.matmul %16, %17, %cst_12 {dimension_numbers = #tpu.dot_dimension_numbers<[1], [0], [0], [1], [0, 0, 1, 1], [], []>} : vector<16x128xbf16>, vector<128x128xbf16>, vector<16x128xf32> -> vector<16x128xf32>
    %20 = vector.broadcast %18 : vector<1x128xf32> to vector<16x128xf32>
    %21 = arith.addf %19, %20 : vector<16x128xf32>
    %cst_13 = arith.constant 0.000000e+00 : f32
    %22 = vector.broadcast %cst_13 : f32 to vector<16x128xf32>
    %23 = arith.maximumf %21, %22 : vector<16x128xf32>
    %24 = arith.truncf %23 : vector<16x128xf32> to vector<16x128xbf16>
    %c0_14 = arith.constant 0 : index
    %c384 = arith.constant 384 : index
    %25 = vector.load %arg2[%c0_14, %c384] : memref<128x1024xbf16, #tpu.memory_space<vmem>>, vector<128x128xbf16>
    %c3 = arith.constant 3 : index
    %c0_15 = arith.constant 0 : index
    %26 = vector.load %arg3[%c3, %c0_15] : memref<8x128xf32, #tpu.memory_space<vmem>>, vector<1x128xf32>
    %cst_16 = arith.constant dense<0.000000e+00> : vector<16x128xf32>
    %27 = tpu.matmul %24, %25, %cst_16 {dimension_numbers = #tpu.dot_dimension_numbers<[1], [0], [0], [1], [0, 0, 1, 1], [], []>} : vector<16x128xbf16>, vector<128x128xbf16>, vector<16x128xf32> -> vector<16x128xf32>
    %28 = vector.broadcast %26 : vector<1x128xf32> to vector<16x128xf32>
    %29 = arith.addf %27, %28 : vector<16x128xf32>
    %30 = math.tanh %29 : vector<16x128xf32>
    %31 = arith.truncf %30 : vector<16x128xf32> to vector<16x128xbf16>
    %c0_17 = arith.constant 0 : index
    %c512 = arith.constant 512 : index
    %32 = vector.load %arg2[%c0_17, %c512] : memref<128x1024xbf16, #tpu.memory_space<vmem>>, vector<128x128xbf16>
    %c4 = arith.constant 4 : index
    %c0_18 = arith.constant 0 : index
    %33 = vector.load %arg3[%c4, %c0_18] : memref<8x128xf32, #tpu.memory_space<vmem>>, vector<1x128xf32>
    %cst_19 = arith.constant dense<0.000000e+00> : vector<16x128xf32>
    %34 = tpu.matmul %31, %32, %cst_19 {dimension_numbers = #tpu.dot_dimension_numbers<[1], [0], [0], [1], [0, 0, 1, 1], [], []>} : vector<16x128xbf16>, vector<128x128xbf16>, vector<16x128xf32> -> vector<16x128xf32>
    %35 = vector.broadcast %33 : vector<1x128xf32> to vector<16x128xf32>
    %36 = arith.addf %34, %35 : vector<16x128xf32>
    %cst_20 = arith.constant 0.000000e+00 : f32
    %37 = vector.broadcast %cst_20 : f32 to vector<16x128xf32>
    %38 = arith.maximumf %36, %37 : vector<16x128xf32>
    %39 = arith.truncf %38 : vector<16x128xf32> to vector<16x128xbf16>
    %c0_21 = arith.constant 0 : index
    %c640 = arith.constant 640 : index
    %40 = vector.load %arg2[%c0_21, %c640] : memref<128x1024xbf16, #tpu.memory_space<vmem>>, vector<128x128xbf16>
    %c5 = arith.constant 5 : index
    %c0_22 = arith.constant 0 : index
    %41 = vector.load %arg3[%c5, %c0_22] : memref<8x128xf32, #tpu.memory_space<vmem>>, vector<1x128xf32>
    %cst_23 = arith.constant dense<0.000000e+00> : vector<16x128xf32>
    %42 = tpu.matmul %39, %40, %cst_23 {dimension_numbers = #tpu.dot_dimension_numbers<[1], [0], [0], [1], [0, 0, 1, 1], [], []>} : vector<16x128xbf16>, vector<128x128xbf16>, vector<16x128xf32> -> vector<16x128xf32>
    %43 = vector.broadcast %41 : vector<1x128xf32> to vector<16x128xf32>
    %44 = arith.addf %42, %43 : vector<16x128xf32>
    %cst_24 = arith.constant 0.000000e+00 : f32
    %45 = vector.broadcast %cst_24 : f32 to vector<16x128xf32>
    %46 = arith.maximumf %44, %45 : vector<16x128xf32>
    %47 = arith.truncf %46 : vector<16x128xf32> to vector<16x128xbf16>
    %c0_25 = arith.constant 0 : index
    %c768 = arith.constant 768 : index
    %48 = vector.load %arg2[%c0_25, %c768] : memref<128x1024xbf16, #tpu.memory_space<vmem>>, vector<128x128xbf16>
    %c6 = arith.constant 6 : index
    %c0_26 = arith.constant 0 : index
    %49 = vector.load %arg3[%c6, %c0_26] : memref<8x128xf32, #tpu.memory_space<vmem>>, vector<1x128xf32>
    %cst_27 = arith.constant dense<0.000000e+00> : vector<16x128xf32>
    %50 = tpu.matmul %47, %48, %cst_27 {dimension_numbers = #tpu.dot_dimension_numbers<[1], [0], [0], [1], [0, 0, 1, 1], [], []>} : vector<16x128xbf16>, vector<128x128xbf16>, vector<16x128xf32> -> vector<16x128xf32>
    %51 = vector.broadcast %49 : vector<1x128xf32> to vector<16x128xf32>
    %52 = arith.addf %50, %51 : vector<16x128xf32>
    %cst_28 = arith.constant 0.000000e+00 : f32
    %53 = vector.broadcast %cst_28 : f32 to vector<16x128xf32>
    %54 = arith.maximumf %52, %53 : vector<16x128xf32>
    %55 = arith.truncf %54 : vector<16x128xf32> to vector<16x128xbf16>
    %c0_29 = arith.constant 0 : index
    %c896 = arith.constant 896 : index
    %56 = vector.load %arg2[%c0_29, %c896] : memref<128x1024xbf16, #tpu.memory_space<vmem>>, vector<128x128xbf16>
    %c7 = arith.constant 7 : index
    %c0_30 = arith.constant 0 : index
    %57 = vector.load %arg3[%c7, %c0_30] : memref<8x128xf32, #tpu.memory_space<vmem>>, vector<1x128xf32>
    %cst_31 = arith.constant dense<0.000000e+00> : vector<16x128xf32>
    %58 = tpu.matmul %55, %56, %cst_31 {dimension_numbers = #tpu.dot_dimension_numbers<[1], [0], [0], [1], [0, 0, 1, 1], [], []>} : vector<16x128xbf16>, vector<128x128xbf16>, vector<16x128xf32> -> vector<16x128xf32>
    %59 = vector.broadcast %57 : vector<1x128xf32> to vector<16x128xf32>
    %60 = arith.addf %58, %59 : vector<16x128xf32>
    %61 = math.tanh %60 : vector<16x128xf32>
    %c0_32 = arith.constant 0 : index
    %c0_33 = arith.constant 0 : index
    %62 = vector.load %arg4[%c0_32, %c0_33] : memref<16x128xf32, #tpu.memory_space<vmem>>, vector<16x128xf32>
    tpu.vector_store %arg4[%c0_32, %c0_33], %61 {strides = array<i32>} : memref<16x128xf32, #tpu.memory_space<vmem>>, vector<16x128xf32>,
    return
  }
  func.func @transform_0(%arg0: i32) -> (i32, i32) {
    %c0_i32 = arith.constant 0 : i32
    %c0_i32_0 = arith.constant 0 : i32
    return %arg0, %c0_i32 : i32, i32
  }
  func.func @transform_1(%arg0: i32) -> (i32, i32) {
    %c0_i32 = arith.constant 0 : i32
    %c0_i32_0 = arith.constant 0 : i32
    %c0_i32_1 = arith.constant 0 : i32
    return %c0_i32, %c0_i32_0 : i32, i32
  }
  func.func @transform_2(%arg0: i32) -> (i32, i32) {
    %c0_i32 = arith.constant 0 : i32
    %c0_i32_0 = arith.constant 0 : i32
    %c0_i32_1 = arith.constant 0 : i32
    return %c0_i32, %c0_i32_0 : i32, i32
  }
  func.func @transform_3(%arg0: i32) -> (i32, i32) {
    %c0_i32 = arith.constant 0 : i32
    %c0_i32_0 = arith.constant 0 : i32
    return %arg0, %c0_i32 : i32, i32
  }
}

</mosaic_0001>

<bundles_post_ra>
// kernel: tpu_custom_call.1
= control target key start
LH: loop header
LB: loop body
LE: loop exit
PB: predicated region body
PF: predicated region fallthrough
CT: control target
= control target key end

     0   :  { %8 = vsyncpa [#allocation3], 0  ;;  %s1566_s0 = inlined_call_operand.hbm [shape: bf16[16,128], index: 0, kind: input, shape index: {}]   ;;  %s1567_s1 = inlined_call_operand.hbm [shape: bf16[128,1024], index: 1, kind: input, shape index: {}]   ;;  %s1568_s2 = inlined_call_operand.hbm [shape: f32[8,128], index: 2, kind: input, shape index: {}]   ;;  %s1569_s3 = inlined_call_operand.hbm [shape: f32[16,128], index: 3, kind: output, shape index: {}]  }
   0x1   :  { %9 = vsyncpa [#allocation6], 0 }
   0x2   :  { %10 = vsyncpa [#allocation4], 0  ;;  %s1406_s12 = smov [#allocation5]   ;;  %s1312_s16 = scalar_lea.hbm %s1567_s1, 8192 }
   0x3   :  { %s28_s13 = sshll.u32 %s1406_s12, 4  ;;  %p1313_p0 = scmp.ne.s32.totalorder %s1567_s1, %s1312_s16  ;;  %s29_s13 = int_to_ptr.vmem [resolvable:$true] %s28_s13 }
   0x4   :  { %p1316_p1 = scmp.lt.u32.totalorder %s1312_s16, %s1567_s1 }
   0x6   :  { %p1318_p2 = pnand %p1316_p1, %p1313_p0 }
   0x8   :  { %1321 = shalt.err (!%p1318_p2)
}
   0x9   :  { %s1322_s21 = scalar_lea.vmem %s29_s13, 8192  ;;  %p1327_p4 = scmp.lt.s32.totalorder %s29_s13, %s29_s13 }
   0xa   :  { %p1323_p3 = scmp.ne.s32.totalorder %s29_s13, %s1322_s21  ;;  %p1328_p5 = scmp.lt.s32.totalorder %s1322_s21, %s1322_s21 }
   0xc   :  { %p1329_p6 = por %p1328_p5, %p1327_p4 }
   0xe   :  { %p1330_p7 = pnand %p1329_p6, %p1323_p3 }
  0x10   :  { %1333 = shalt.err (!%p1330_p7)
}
  0x11   :  { %s1407_s22 = smov 512   ;;  %s1408_s23 = smov 32  }
  0x12   :  { %34 = dma.hbm_to_vmem [thread:$0]  %s1567_s1, 8192, %s29_s13, [#allocation6], %s1407_s22, %s1407_s22, %s1408_s23  }
  0x13   :  { %s1409_s26 = smov [#allocation2]   ;;  %s1334_s30 = scalar_lea.hbm %s1566_s0, 128 }
  0x14   :  { %s16_s27 = sshll.u32 %s1409_s26, 4  ;;  %p1335_p8 = scmp.ne.s32.totalorder %s1566_s0, %s1334_s30  ;;  %s17_s27 = int_to_ptr.vmem [resolvable:$true] %s16_s27 }
  0x15   :  { %p1338_p9 = scmp.lt.u32.totalorder %s1334_s30, %s1566_s0 }
  0x17   :  { %p1340_p10 = pnand %p1338_p9, %p1335_p8 }
  0x19   :  { %1343 = shalt.err (!%p1340_p10)
}
  0x1a   :  { %s1344_s8 = scalar_lea.vmem %s17_s27, 128  ;;  %p1349_p12 = scmp.lt.s32.totalorder %s17_s27, %s17_s27 }
  0x1b   :  { %p1345_p11 = scmp.ne.s32.totalorder %s17_s27, %s1344_s8  ;;  %p1350_p13 = scmp.lt.s32.totalorder %s1344_s8, %s1344_s8 }
  0x1d   :  { %p1351_p0 = por %p1350_p13, %p1349_p12 }
  0x1f   :  { %p1352_p1 = pnand %p1351_p0, %p1345_p11 }
  0x21   :  { %1355 = shalt.err (!%p1352_p1)
}
  0x22   :  { %s1410_s1 = smov 64   ;;  %s1411_s9 = smov 4  }
  0x23   :  { %22 = dma.hbm_to_vmem [thread:$0]  %s1566_s0, 128, %s17_s27, [#allocation3], %s1410_s1, %s1410_s1, %s1411_s9  }
  0x24   :  { %s1412_s12 = smov [#allocation7]   ;;  %s1356_s16 = scalar_lea.hbm %s1568_s2, 128 }
  0x25   :  { %s41_s13 = sshll.u32 %s1412_s12, 4  ;;  %p1357_p2 = scmp.ne.s32.totalorder %s1568_s2, %s1356_s16  ;;  %s42_s13 = int_to_ptr.vmem [resolvable:$true] %s41_s13 }
  0x26   :  { %p1360_p3 = scmp.lt.u32.totalorder %s1356_s16, %s1568_s2 }
  0x28   :  { %p1362_p4 = pnand %p1360_p3, %p1357_p2 }
  0x2a   :  { %1365 = shalt.err (!%p1362_p4)
}
  0x2b   :  { %s1366_s21 = scalar_lea.vmem %s42_s13, 128  ;;  %p1371_p6 = scmp.lt.s32.totalorder %s42_s13, %s42_s13 }
  0x2c   :  { %p1367_p5 = scmp.ne.s32.totalorder %s42_s13, %s1366_s21  ;;  %p1372_p7 = scmp.lt.s32.totalorder %s1366_s21, %s1366_s21 }
  0x2e   :  { %p1373_p8 = por %p1372_p7, %p1371_p6 }
  0x30   :  { %p1374_p9 = pnand %p1373_p8, %p1367_p5 }
  0x32   :  { %1377 = shalt.err (!%p1374_p9)
}
  0x33   :  { %44 = dma.hbm_to_vmem [thread:$0]  %s1568_s2, 128, %s42_s13, [#allocation6]  }
  0x34   :  { %1400 = dma.done.wait [#allocation3], 128  }
  0x35   :  { %1401 = vsyncadd [#allocation3], 4294967168 }
  0x36   :  { %1402 = dma.done.wait [#allocation6], 8320  }
  0x37   :  { %1403 = vsyncadd [#allocation6], 4294958976  ;;  %v1413_v0 = vmov 0.0   ;;  %vm1414_vm0 = vmmov 0   ;;  %v57_v1 = vld [vmem:[#allocation5] sm:$0xf] }
  0x38   :  { %1131 = vmatprep.subr.bf16.mxu0 %v1413_v0  ;;  %1147 = vmatprep.mubr.msk.bf16.mxu0 %vm1414_vm0, %v1413_v0  ;;  %v58_v2 = vld [vmem:[#allocation5 + $0x20] sm:$0xf]  ;;  %v176_v9 = vld [vmem:[#allocation5 + $0x4] sm:$0xf]  ;;  %v1303_v43 = vld [vmem:[#allocation2] sm:$0xff]   ;;  %s1415_s2 = smov [#allocation8]  }
  0x39   :  { %1151 = vmatprep.subr.bf16.mxu1 %v1413_v0  ;;  %1167 = vmatprep.mubr.msk.bf16.mxu1 %vm1414_vm0, %v1413_v0  ;;  %v59_v3 = vld [vmem:[#allocation5 + $0x40] sm:$0xf]  ;;  %v988_v4 = vcombine.low %v57_v1, %v58_v2  ;;  %v177_v10 = vld [vmem:[#allocation5 + $0x24] sm:$0xf]  ;;  %v289_v50 = vld [vmem:[#allocation5 + $0x8] sm:$0xf] }
  0x3a   :  { %v60_v5 = vld [vmem:[#allocation5 + $0x60] sm:$0xf]  ;;  %v997_v12 = vcombine.low %v176_v9, %v177_v10  ;;  %v178_v13 = vld [vmem:[#allocation5 + $0x44] sm:$0xf]  ;;  %v290_v51 = vld [vmem:[#allocation5 + $0x28] sm:$0xf] }
  0x3b   :  { %1132 = vmatpush3.bf16.msra.mxu0 %v988_v4  ;;  %v989_v6 = vcombine.low %v59_v3, %v60_v5  ;;  %v61_v7 = vld [vmem:[#allocation5 + $0x80] sm:$0xf]  ;;  %v179_v14 = vld [vmem:[#allocation5 + $0x64] sm:$0xf]  ;;  %v291_v52 = vld [vmem:[#allocation5 + $0x48] sm:$0xf]  ;;  %v1006_v53 = vcombine.low %v289_v50, %v290_v51 }
  0x3c   :  { %1133 = vmatprep.subr.bf16.mxu0 %v1413_v0  ;;  %v62_v8 = vld [vmem:[#allocation5 + $0xa0] sm:$0xf]  ;;  %1152 = vmatpush3.bf16.msra.mxu1 %v997_v12  ;;  %v998_v17 = vcombine.low %v178_v13, %v179_v14  ;;  %v180_v18 = vld [vmem:[#allocation5 + $0x84] sm:$0xf]  ;;  %v292_v54 = vld [vmem:[#allocation5 + $0x68] sm:$0xf] }
  0x3d   :  { %v990_v11 = vcombine.low %v61_v7, %v62_v8  ;;  %v63_v15 = vld [vmem:[#allocation5 + $0xc0] sm:$0xf]  ;;  %1153 = vmatprep.subr.bf16.mxu1 %v1413_v0  ;;  %v181_v19 = vld [vmem:[#allocation5 + $0xa4] sm:$0xf]  ;;  %v1007_v55 = vcombine.low %v291_v52, %v292_v54  ;;  %v293_v56 = vld [vmem:[#allocation5 + $0x88] sm:$0xf] }
  0x3e   :  { %v64_v16 = vld [vmem:[#allocation5 + $0xe0] sm:$0xf]  ;;  %v999_v23 = vcombine.low %v180_v18, %v181_v19  ;;  %v182_v24 = vld [vmem:[#allocation5 + $0xc4] sm:$0xf]  ;;  %v294_v57 = vld [vmem:[#allocation5 + $0xa8] sm:$0xf] }
  0x3f   :  { %1134 = vmatpush3.bf16.msra.mxu0 %v989_v6  ;;  %v991_v20 = vcombine.low %v63_v15, %v64_v16  ;;  %v65_v21 = vld [vmem:[#allocation5 + $0x100] sm:$0xf]  ;;  %v183_v25 = vld [vmem:[#allocation5 + $0xe4] sm:$0xf]  ;;  %v1008_v58 = vcombine.low %v293_v56, %v294_v57  ;;  %v295_v59 = vld [vmem:[#allocation5 + $0xc8] sm:$0xf] }
  0x40   :  { %1135 = vmatprep.subr.bf16.mxu0 %v1413_v0  ;;  %v66_v22 = vld [vmem:[#allocation5 + $0x120] sm:$0xf]  ;;  %1154 = vmatpush3.bf16.msra.mxu1 %v998_v17  ;;  %v1000_v29 = vcombine.low %v182_v24, %v183_v25  ;;  %v184_v30 = vld [vmem:[#allocation5 + $0x104] sm:$0xf]  ;;  %v296_v60 = vld [vmem:[#allocation5 + $0xe8] sm:$0xf] }
  0x41   :  { %1155 = vmatprep.subr.bf16.mxu1 %v1413_v0  ;;  %v992_v26 = vcombine.low %v65_v21, %v66_v22  ;;  %v67_v27 = vld [vmem:[#allocation5 + $0x140] sm:$0xf]  ;;  %v185_v31 = vld [vmem:[#allocation5 + $0x124] sm:$0xf]  ;;  %v1009_v61 = vcombine.low %v295_v59, %v296_v60  ;;  %v297_v62 = vld [vmem:[#allocation5 + $0x108] sm:$0xf] }
  0x42   :  { %v68_v28 = vld [vmem:[#allocation5 + $0x160] sm:$0xf]  ;;  %v1001_v35 = vcombine.low %v184_v30, %v185_v31  ;;  %v186_v36 = vld [vmem:[#allocation5 + $0x144] sm:$0xf]  ;;  %v298_v63 = vld [vmem:[#allocation5 + $0x128] sm:$0xf] }
  0x43   :  { %1136 = vmatpush3.bf16.msra.mxu0 %v990_v11  ;;  %v993_v32 = vcombine.low %v67_v27, %v68_v28  ;;  %v69_v33 = vld [vmem:[#allocation5 + $0x180] sm:$0xf]  ;;  %v187_v37 = vld [vmem:[#allocation5 + $0x164] sm:$0xf]  ;;  %v1010_v1 = vcombine.low %v297_v62, %v298_v63  ;;  %v299_v2 = vld [vmem:[#allocation5 + $0x148] sm:$0xf] }
  0x44   :  { %1137 = vmatprep.subr.bf16.mxu0 %v1413_v0  ;;  %1156 = vmatpush3.bf16.msra.mxu1 %v999_v23  ;;  %v70_v34 = vld [vmem:[#allocation5 + $0x1a0] sm:$0xf]  ;;  %v1002_v41 = vcombine.low %v186_v36, %v187_v37  ;;  %v188_v44 = vld [vmem:[#allocation5 + $0x184] sm:$0xf]  ;;  %v300_v3 = vld [vmem:[#allocation5 + $0x168] sm:$0xf] }
  0x45   :  { %1157 = vmatprep.subr.bf16.mxu1 %v1413_v0  ;;  %v994_v38 = vcombine.low %v69_v33, %v70_v34  ;;  %v71_v39 = vld [vmem:[#allocation5 + $0x1c0] sm:$0xf]  ;;  %v189_v45 = vld [vmem:[#allocation5 + $0x1a4] sm:$0xf]  ;;  %v1011_v4 = vcombine.low %v299_v2, %v300_v3  ;;  %v301_v15 = vld [vmem:[#allocation5 + $0x188] sm:$0xf] }
  0x46   :  { %v72_v40 = vld [vmem:[#allocation5 + $0x1e0] sm:$0xf]  ;;  %v1003_v46 = vcombine.low %v188_v44, %v189_v45  ;;  %v190_v47 = vld [vmem:[#allocation5 + $0x1c4] sm:$0xf]  ;;  %v302_v16 = vld [vmem:[#allocation5 + $0x1a8] sm:$0xf] }
  0x47   :  { %1138 = vmatpush3.bf16.msra.mxu0 %v991_v20  ;;  %v995_v42 = vcombine.low %v71_v39, %v72_v40  ;;  %v191_v48 = vld [vmem:[#allocation5 + $0x1e4] sm:$0xf]  ;;  %v986_v5 = vld [vmem:[#allocation7] ss:$0 sm:$0xff]  ;;  %v1012_v17 = vcombine.low %v301_v15, %v302_v16  ;;  %v303_v18 = vld [vmem:[#allocation5 + $0x1c8] sm:$0xf] }
  0x48   :  { %1139 = vmatprep.subr.bf16.mxu0 %v1413_v0  ;;  %1158 = vmatpush3.bf16.msra.mxu1 %v1000_v29  ;;  %v1004_v49 = vcombine.low %v190_v47, %v191_v48  ;;  %v304_v19 = vld [vmem:[#allocation5 + $0x1e8] sm:$0xf]  ;;  %v402_v21 = vld [vmem:[#allocation5 + $0xc] sm:$0xf]  ;;  %v996_v39 = vld [vmem:[#allocation7 + $0x1] ss:$0 sm:$0xff] }
  0x49   :  { %1159 = vmatprep.subr.bf16.mxu1 %v1413_v0  ;;  %v1013_v20 = vcombine.low %v303_v18, %v304_v19  ;;  %v403_v22 = vld [vmem:[#allocation5 + $0x2c] sm:$0xf]  ;;  %v516_v56 = vld [vmem:[#allocation5 + $0x30] sm:$0xf]  ;;  %s973_s23 = sshll.u32 %s1415_s2, 4  ;;  %s974_s23 = int_to_ptr.vmem [resolvable:$true] %s973_s23 }
  0x4a   :  { %v404_v23 = vld [vmem:[#allocation5 + $0x4c] sm:$0xf]  ;;  %v1015_v24 = vcombine.low %v402_v21, %v403_v22  ;;  %v517_v57 = vld [vmem:[#allocation5 + $0x50] sm:$0xf]  ;;  %s1378_s24 = scalar_lea.vmem %s974_s23, 256  ;;  %p1383_p11 = scmp.lt.s32.totalorder %s974_s23, %s974_s23 }
  0x4b   :  { %1140 = vmatpush3.bf16.msra.mxu0 %v992_v26  ;;  %v405_v25 = vld [vmem:[#allocation5 + $0x6c] sm:$0xf]  ;;  %v518_v59 = vld [vmem:[#allocation5 + $0x70] sm:$0xf]  ;;  %p1379_p10 = scmp.ne.s32.totalorder %s974_s23, %s1378_s24  ;;  %p1384_p12 = scmp.lt.s32.totalorder %s1378_s24, %s1378_s24 }
  0x4c   :  { %1141 = vmatprep.subr.bf16.mxu0 %v1413_v0  ;;  %1160 = vmatpush3.bf16.msra.mxu1 %v1001_v35  ;;  %v1016_v26 = vcombine.low %v404_v23, %v405_v25  ;;  %v406_v27 = vld [vmem:[#allocation5 + $0x8c] sm:$0xf]  ;;  %v1025_v60 = vcombine.low %v517_v57, %v518_v59  ;;  %v520_v62 = vld [vmem:[#allocation5 + $0xb0] sm:$0xf]  ;;  %v642_v57 = vld [vmem:[#allocation5 + $0x1d4] sm:$0xf] }
  0x4d   :  { %1161 = vmatprep.subr.bf16.mxu1 %v1413_v0  ;;  %v407_v28 = vld [vmem:[#allocation5 + $0xac] sm:$0xf]  ;;  %v522_v2 = vld [vmem:[#allocation5 + $0xf0] sm:$0xf]  ;;  %p1385_p13 = por %p1384_p12, %p1383_p11 }
  0x4e   :  { %v1017_v29 = vcombine.low %v406_v27, %v407_v28  ;;  %v408_v30 = vld [vmem:[#allocation5 + $0xcc] sm:$0xf]  ;;  %v524_v15 = vld [vmem:[#allocation5 + $0x130] sm:$0xf]  ;;  %v629_v27 = vld [vmem:[#allocation5 + $0x34] sm:$0xf] }
  0x4f   :  { %1142 = vmatpush3.bf16.msra.mxu0 %v993_v32  ;;  %v409_v31 = vld [vmem:[#allocation5 + $0xec] sm:$0xf]  ;;  %v526_v18 = vld [vmem:[#allocation5 + $0x170] sm:$0xf]  ;;  %v630_v28 = vld [vmem:[#allocation5 + $0x54] sm:$0xf]  ;;  %p1386_p0 = pnand %p1385_p13, %p1379_p10 }
  0x50   :  { %1143 = vmatprep.subr.bf16.mxu0 %v1413_v0  ;;  %1162 = vmatpush3.bf16.msra.mxu1 %v1002_v41  ;;  %v1018_v32 = vcombine.low %v408_v30, %v409_v31  ;;  %v410_v33 = vld [vmem:[#allocation5 + $0x10c] sm:$0xf]  ;;  %v528_v21 = vld [vmem:[#allocation5 + $0x1b0] sm:$0xf]  ;;  %v631_v30 = vld [vmem:[#allocation5 + $0x74] sm:$0xf] }
  0x51   :  { %1163 = vmatprep.subr.bf16.mxu1 %v1413_v0  ;;  %v411_v34 = vld [vmem:[#allocation5 + $0x12c] sm:$0xf]  ;;  %v529_v23 = vld [vmem:[#allocation5 + $0x1d0] sm:$0xf]  ;;  %v1034_v31 = vcombine.low %v630_v28, %v631_v30  ;;  %v755_v28 = vld [vmem:[#allocation5 + $0x1d8] sm:$0xf] }
  0x52   :  { %v1019_v35 = vcombine.low %v410_v33, %v411_v34  ;;  %v412_v36 = vld [vmem:[#allocation5 + $0x14c] sm:$0xf]  ;;  %v633_v33 = vld [vmem:[#allocation5 + $0xb4] sm:$0xf] }
  0x53   :  { %1144 = vmatpush3.bf16.msra.mxu0 %v994_v38  ;;  %v413_v37 = vld [vmem:[#allocation5 + $0x16c] sm:$0xf] }
  0x54   :  { %1145 = vmatprep.subr.bf16.mxu0 %v1413_v0  ;;  %1164 = vmatpush3.bf16.msra.mxu1 %v1003_v46  ;;  %v1020_v38 = vcombine.low %v412_v36, %v413_v37  ;;  %v415_v50 = vld [vmem:[#allocation5 + $0x1ac] sm:$0xf]  ;;  %v635_v36 = vld [vmem:[#allocation5 + $0xf4] sm:$0xf] }
  0x55   :  { %1165 = vmatprep.subr.bf16.mxu1 %v1413_v0  ;;  %v416_v52 = vld [vmem:[#allocation5 + $0x1cc] sm:$0xf] }
  0x57   :  { %1146 = vmatpush3.bf16.msra.mxu0 %v995_v42 }
  0x58   :  { %1171 = vmatprep.subr.bf16.mxu0 %v1413_v0  ;;  %1166 = vmatpush3.bf16.msra.mxu1 %v1004_v49  ;;  %v414_v49 = vld [vmem:[#allocation5 + $0x18c] sm:$0xf] }
  0x59   :  { %1191 = vmatprep.subr.bf16.mxu1 %v1413_v0  ;;  %v1021_v51 = vcombine.low %v414_v49, %v415_v50 }
  0x5a   :  { %1148 = vmatmul.mubr.bf16.vlgmr.msra.gmra.mrb[0].mxu0 %v1303_v43 }
  0x5b   :  { %1187 = vmatprep.mubr.msk.bf16.mxu0 %vm1414_vm0, %v1413_v0  ;;  %1172 = vmatpush3.bf16.msra.mxu0 %v1006_v53  ;;  %v417_v53 = vld [vmem:[#allocation5 + $0x1ec] sm:$0xf] }
  0x5c   :  { %1173 = vmatprep.subr.bf16.mxu0 %v1413_v0  ;;  %v1022_v54 = vcombine.low %v416_v52, %v417_v53 }
  0x5f   :  { %1174 = vmatpush3.bf16.msra.mxu0 %v1007_v55  ;;  %v515_v55 = vld [vmem:[#allocation5 + $0x10] sm:$0xf] }
  0x60   :  { %1175 = vmatprep.subr.bf16.mxu0 %v1413_v0 }
  0x63   :  { %1176 = vmatpush3.bf16.msra.mxu0 %v1008_v58  ;;  %v1024_v58 = vcombine.low %v515_v55, %v516_v56  ;;  %v641_v55 = vld [vmem:[#allocation5 + $0x1b4] sm:$0xf] }
  0x64   :  { %1177 = vmatprep.subr.bf16.mxu0 %v1413_v0 }
  0x67   :  { %1178 = vmatpush3.bf16.msra.mxu0 %v1009_v61  ;;  %v519_v61 = vld [vmem:[#allocation5 + $0x90] sm:$0xf] }
  0x68   :  { %1179 = vmatprep.subr.bf16.mxu0 %v1413_v0  ;;  %v1026_v63 = vcombine.low %v519_v61, %v520_v62  ;;  %v742_v61 = vld [vmem:[#allocation5 + $0x38] sm:$0xf] }
  0x69   :  { %v743_v62 = vld [vmem:[#allocation5 + $0x58] sm:$0xf] }
  0x6b   :  { %1180 = vmatpush3.bf16.msra.mxu0 %v1010_v1  ;;  %v521_v1 = vld [vmem:[#allocation5 + $0xd0] sm:$0xf] }
  0x6c   :  { %1181 = vmatprep.subr.bf16.mxu0 %v1413_v0  ;;  %v1027_v3 = vcombine.low %v521_v1, %v522_v2  ;;  %v744_v1 = vld [vmem:[#allocation5 + $0x78] sm:$0xf] }
  0x6d   :  { %v1043_v2 = vcombine.low %v743_v62, %v744_v1  ;;  %v868_v62 = vld [vmem:[#allocation5 + $0x1dc] sm:$0xf] }
  0x6f   :  { %1182 = vmatpush3.bf16.msra.mxu0 %v1011_v4  ;;  %v1005_v4 = vld [vmem:[#allocation7 + $0x2] ss:$0 sm:$0xff] }
  0x70   :  { %1183 = vmatprep.subr.bf16.mxu0 %v1413_v0 }
  0x73   :  { %1184 = vmatpush3.bf16.msra.mxu0 %v1012_v17  ;;  %v525_v17 = vld [vmem:[#allocation5 + $0x150] sm:$0xf] }
  0x74   :  { %1185 = vmatprep.subr.bf16.mxu0 %v1413_v0  ;;  %v1029_v19 = vcombine.low %v525_v17, %v526_v18 }
  0x77   :  { %1186 = vmatpush3.bf16.msra.mxu0 %v1013_v20  ;;  %v527_v20 = vld [vmem:[#allocation5 + $0x190] sm:$0xf] }
  0x78   :  { %1211 = vmatprep.subr.bf16.mxu0 %v1413_v0  ;;  %v1030_v22 = vcombine.low %v527_v20, %v528_v21 }
 0x12d   :  { %v166_v6 = vpop.f32.mrb[0].mxu0 }
 0x12e   :  { %v167_v7 = vadd.f32 %v986_v5, %v166_v6  ;;  %v1149_v8 = vpop.f32.mrb[1].mxu0 }
 0x12f   :  { %v169_v9 = vpop.f32.mrb[2].mxu0 }
 0x130   :  { %v170_v10 = vadd.f32 %v986_v5, %v169_v9  ;;  %v1150_v11 = vpop.f32.mrb[3].mxu0  ;;  %v173_v12 = vmax.f32 %v167_v7, 0.0 }
 0x132   :  { %v174_v13 = vmax.f32 %v170_v10, 0.0 }
 0x134   :  { %v175_v14 = vpack.c.bf16 %v174_v13, %v173_v12 }
 0x136   :  { %1168 = vmatmul.mubr.bf16.vlgmr.msra.gmra.mrb[0].mxu1 %v175_v14  ;;  %v523_v14 = vld [vmem:[#allocation5 + $0x110] sm:$0xf] }
 0x137   :  { %1207 = vmatprep.mubr.msk.bf16.mxu1 %vm1414_vm0, %v1413_v0  ;;  %1192 = vmatpush3.bf16.msra.mxu1 %v1015_v24  ;;  %v1028_v16 = vcombine.low %v523_v14, %v524_v15  ;;  %v530_v24 = vld [vmem:[#allocation5 + $0x1f0] sm:$0xf]  ;;  %v1023_v15 = vld [vmem:[#allocation7 + $0x4] ss:$0 sm:$0xff] }
 0x138   :  { %1193 = vmatprep.subr.bf16.mxu1 %v1413_v0  ;;  %v1031_v25 = vcombine.low %v529_v23, %v530_v24 }
 0x13b   :  { %1194 = vmatpush3.bf16.msra.mxu1 %v1016_v26  ;;  %v628_v26 = vld [vmem:[#allocation5 + $0x14] sm:$0xf] }
 0x13c   :  { %1195 = vmatprep.subr.bf16.mxu1 %v1413_v0 }
 0x13f   :  { %1196 = vmatpush3.bf16.msra.mxu1 %v1017_v29  ;;  %v1033_v29 = vcombine.low %v628_v26, %v629_v27  ;;  %v754_v26 = vld [vmem:[#allocation5 + $0x1b8] sm:$0xf] }
 0x140   :  { %1197 = vmatprep.subr.bf16.mxu1 %v1413_v0 }
 0x143   :  { %1198 = vmatpush3.bf16.msra.mxu1 %v1018_v32  ;;  %v632_v32 = vld [vmem:[#allocation5 + $0x94] sm:$0xf] }
 0x144   :  { %1199 = vmatprep.subr.bf16.mxu1 %v1413_v0  ;;  %v1035_v34 = vcombine.low %v632_v32, %v633_v33  ;;  %v855_v32 = vld [vmem:[#allocation5 + $0x3c] sm:$0xf] }
 0x145   :  { %v856_v33 = vld [vmem:[#allocation5 + $0x5c] sm:$0xf] }
 0x147   :  { %1200 = vmatpush3.bf16.msra.mxu1 %v1019_v35  ;;  %v634_v35 = vld [vmem:[#allocation5 + $0xd4] sm:$0xf] }
 0x148   :  { %1201 = vmatprep.subr.bf16.mxu1 %v1413_v0  ;;  %v1036_v37 = vcombine.low %v634_v35, %v635_v36  ;;  %v857_v35 = vld [vmem:[#allocation5 + $0x7c] sm:$0xf] }
 0x149   :  { %v1052_v36 = vcombine.low %v856_v33, %v857_v35 }
 0x14b   :  { %1202 = vmatpush3.bf16.msra.mxu1 %v1020_v38  ;;  %v636_v38 = vld [vmem:[#allocation5 + $0x114] sm:$0xf] }
 0x14c   :  { %1203 = vmatprep.subr.bf16.mxu1 %v1413_v0 }
 0x14f   :  { %1204 = vmatpush3.bf16.msra.mxu1 %v1021_v51 }
 0x150   :  { %1205 = vmatprep.subr.bf16.mxu1 %v1413_v0 }
 0x153   :  { %1206 = vmatpush3.bf16.msra.mxu1 %v1022_v54  ;;  %v640_v54 = vld [vmem:[#allocation5 + $0x194] sm:$0xf] }
 0x154   :  { %1231 = vmatprep.subr.bf16.mxu1 %v1413_v0  ;;  %v1039_v56 = vcombine.low %v640_v54, %v641_v55 }
 0x209   :  { %v279_v40 = vpop.f32.mrb[0].mxu1 }
 0x20a   :  { %v280_v41 = vadd.f32 %v996_v39, %v279_v40  ;;  %v1169_v42 = vpop.f32.mrb[1].mxu1 }
 0x20b   :  { %v282_v43 = vpop.f32.mrb[2].mxu1  ;;  %v639_v42 = vld [vmem:[#allocation5 + $0x174] sm:$0xf] }
 0x20c   :  { %v283_v44 = vadd.f32 %v996_v39, %v282_v43  ;;  %v1170_v45 = vpop.f32.mrb[3].mxu1  ;;  %v286_v46 = vmax.f32 %v280_v41, 0.0  ;;  %v637_v39 = vld [vmem:[#allocation5 + $0x134] sm:$0xf] }
 0x20d   :  { %v1037_v40 = vcombine.low %v636_v38, %v637_v39  ;;  %v638_v41 = vld [vmem:[#allocation5 + $0x154] sm:$0xf]  ;;  %v859_v38 = vld [vmem:[#allocation5 + $0xbc] sm:$0xf] }
 0x20e   :  { %v287_v47 = vmax.f32 %v283_v44, 0.0  ;;  %v1038_v43 = vcombine.low %v638_v41, %v639_v42  ;;  %v1014_v44 = vld [vmem:[#allocation7 + $0x3] ss:$0 sm:$0xff]  ;;  %v861_v41 = vld [vmem:[#allocation5 + $0xfc] sm:$0xf] }
 0x210   :  { %v288_v48 = vpack.c.bf16 %v287_v47, %v286_v46 }
 0x212   :  { %1188 = vmatmul.mubr.bf16.vlgmr.msra.gmra.mrb[4].mxu0 %v288_v48 }
 0x213   :  { %1227 = vmatprep.mubr.msk.bf16.mxu0 %vm1414_vm0, %v1413_v0  ;;  %1212 = vmatpush3.bf16.msra.mxu0 %v1024_v58  ;;  %v643_v58 = vld [vmem:[#allocation5 + $0x1f4] sm:$0xf] }
 0x214   :  { %1213 = vmatprep.subr.bf16.mxu0 %v1413_v0  ;;  %v1040_v59 = vcombine.low %v642_v57, %v643_v58 }
 0x217   :  { %1214 = vmatpush3.bf16.msra.mxu0 %v1025_v60  ;;  %v741_v60 = vld [vmem:[#allocation5 + $0x18] sm:$0xf] }
 0x218   :  { %1215 = vmatprep.subr.bf16.mxu0 %v1413_v0 }
 0x21b   :  { %1216 = vmatpush3.bf16.msra.mxu0 %v1026_v63  ;;  %v1042_v63 = vcombine.low %v741_v60, %v742_v61  ;;  %v867_v60 = vld [vmem:[#allocation5 + $0x1bc] sm:$0xf] }
 0x21c   :  { %1217 = vmatprep.subr.bf16.mxu0 %v1413_v0 }
 0x21f   :  { %1218 = vmatpush3.bf16.msra.mxu0 %v1027_v3  ;;  %v745_v3 = vld [vmem:[#allocation5 + $0x98] sm:$0xf] }
 0x220   :  { %1219 = vmatprep.subr.bf16.mxu0 %v1413_v0 }
 0x223   :  { %1220 = vmatpush3.bf16.msra.mxu0 %v1028_v16 }
 0x224   :  { %1221 = vmatprep.subr.bf16.mxu0 %v1413_v0 }
 0x227   :  { %1222 = vmatpush3.bf16.msra.mxu0 %v1029_v19 }
 0x228   :  { %1223 = vmatprep.subr.bf16.mxu0 %v1413_v0 }
 0x22b   :  { %1224 = vmatpush3.bf16.msra.mxu0 %v1030_v22 }
 0x22c   :  { %1225 = vmatprep.subr.bf16.mxu0 %v1413_v0 }
 0x22f   :  { %1226 = vmatpush3.bf16.msra.mxu0 %v1031_v25  ;;  %v753_v25 = vld [vmem:[#allocation5 + $0x198] sm:$0xf] }
 0x230   :  { %1251 = vmatprep.subr.bf16.mxu0 %v1413_v0  ;;  %v1048_v27 = vcombine.low %v753_v25, %v754_v26 }
 0x2e5   :  { %v392_v5 = vpop.f32.mrb[4].mxu0 }
 0x2e6   :  { %v393_v6 = vadd.f32 %v1005_v4, %v392_v5  ;;  %v1189_v7 = vpop.f32.mrb[5].mxu0 }
 0x2e7   :  { %v395_v8 = vpop.f32.mrb[6].mxu0  ;;  %v748_v7 = vld [vmem:[#allocation5 + $0xf8] sm:$0xf] }
 0x2e8   :  { %v396_v9 = vadd.f32 %v1005_v4, %v395_v8  ;;  %v1190_v10 = vpop.f32.mrb[7].mxu0  ;;  %v399_v11 = vmax.f32 %v393_v6, 0.0  ;;  %v746_v4 = vld [vmem:[#allocation5 + $0xb8] sm:$0xf] }
 0x2e9   :  { %v1044_v5 = vcombine.low %v745_v3, %v746_v4  ;;  %v747_v6 = vld [vmem:[#allocation5 + $0xd8] sm:$0xf] }
 0x2ea   :  { %v400_v12 = vmax.f32 %v396_v9, 0.0  ;;  %v1045_v8 = vcombine.low %v747_v6, %v748_v7  ;;  %v749_v9 = vld [vmem:[#allocation5 + $0x118] sm:$0xf] }
 0x2eb   :  { %v750_v10 = vld [vmem:[#allocation5 + $0x138] sm:$0xf] }
 0x2ec   :  { %v401_v13 = vpack.c.bf16 %v400_v12, %v399_v11  ;;  %v1046_v11 = vcombine.low %v749_v9, %v750_v10  ;;  %v751_v12 = vld [vmem:[#allocation5 + $0x158] sm:$0xf] }
 0x2ee   :  { %1208 = vmatmul.mubr.bf16.vlgmr.msra.gmra.mrb[4].mxu1 %v401_v13  ;;  %v752_v13 = vld [vmem:[#allocation5 + $0x178] sm:$0xf] }
 0x2ef   :  { %1247 = vmatprep.mubr.msk.bf16.mxu1 %vm1414_vm0, %v1413_v0  ;;  %1232 = vmatpush3.bf16.msra.mxu1 %v1033_v29  ;;  %v1047_v14 = vcombine.low %v751_v12, %v752_v13  ;;  %v756_v29 = vld [vmem:[#allocation5 + $0x1f8] sm:$0xf]  ;;  %v1050_v12 = vld [vmem:[#allocation7 + $0x7] ss:$0 sm:$0xff] }
 0x2f0   :  { %1233 = vmatprep.subr.bf16.mxu1 %v1413_v0  ;;  %v1049_v30 = vcombine.low %v755_v28, %v756_v29 }
 0x2f3   :  { %1234 = vmatpush3.bf16.msra.mxu1 %v1034_v31  ;;  %v854_v31 = vld [vmem:[#allocation5 + $0x1c] sm:$0xf] }
 0x2f4   :  { %1235 = vmatprep.subr.bf16.mxu1 %v1413_v0 }
 0x2f7   :  { %1236 = vmatpush3.bf16.msra.mxu1 %v1035_v34  ;;  %v1051_v34 = vcombine.low %v854_v31, %v855_v32 }
 0x2f8   :  { %1237 = vmatprep.subr.bf16.mxu1 %v1413_v0 }
 0x2fb   :  { %1238 = vmatpush3.bf16.msra.mxu1 %v1036_v37  ;;  %v858_v37 = vld [vmem:[#allocation5 + $0x9c] sm:$0xf] }
 0x2fc   :  { %1239 = vmatprep.subr.bf16.mxu1 %v1413_v0  ;;  %v1053_v39 = vcombine.low %v858_v37, %v859_v38 }
 0x2ff   :  { %1240 = vmatpush3.bf16.msra.mxu1 %v1037_v40  ;;  %v860_v40 = vld [vmem:[#allocation5 + $0xdc] sm:$0xf] }
 0x300   :  { %1241 = vmatprep.subr.bf16.mxu1 %v1413_v0  ;;  %v1054_v42 = vcombine.low %v860_v40, %v861_v41 }
 0x303   :  { %1242 = vmatpush3.bf16.msra.mxu1 %v1038_v43  ;;  %v862_v43 = vld [vmem:[#allocation5 + $0x11c] sm:$0xf] }
 0x304   :  { %1243 = vmatprep.subr.bf16.mxu1 %v1413_v0 }
 0x307   :  { %1244 = vmatpush3.bf16.msra.mxu1 %v1039_v56 }
 0x308   :  { %1245 = vmatprep.subr.bf16.mxu1 %v1413_v0 }
 0x30b   :  { %1246 = vmatpush3.bf16.msra.mxu1 %v1040_v59  ;;  %v866_v59 = vld [vmem:[#allocation5 + $0x19c] sm:$0xf] }
 0x30c   :  { %1271 = vmatprep.subr.bf16.mxu1 %v1413_v0  ;;  %v1057_v61 = vcombine.low %v866_v59, %v867_v60 }
 0x3c1   :  { %v505_v45 = vpop.f32.mrb[4].mxu1 }
 0x3c2   :  { %v506_v46 = vadd.f32 %v1014_v44, %v505_v45  ;;  %v1209_v47 = vpop.f32.mrb[5].mxu1 }
 0x3c3   :  { %v508_v48 = vpop.f32.mrb[6].mxu1  ;;  %v865_v47 = vld [vmem:[#allocation5 + $0x17c] sm:$0xf] }
 0x3c4   :  { %v509_v49 = vadd.f32 %v1014_v44, %v508_v48  ;;  %v1210_v50 = vpop.f32.mrb[7].mxu1  ;;  %1304 = vtanh.f32 %v506_v46  ;;  %v863_v44 = vld [vmem:[#allocation5 + $0x13c] sm:$0xf] }
 0x3c5   :  { %v1055_v45 = vcombine.low %v862_v43, %v863_v44  ;;  %v864_v46 = vld [vmem:[#allocation5 + $0x15c] sm:$0xf] }
 0x3c6   :  { %1306 = vtanh.f32 %v509_v49  ;;  %v1056_v48 = vcombine.low %v864_v46, %v865_v47  ;;  %v1032_v49 = vld [vmem:[#allocation7 + $0x5] ss:$0 sm:$0xff] }
 0x3ce   :  { %v1305_v51 = vpop.eup %1304 }
 0x3d0   :  { %v1307_v52 = vpop.eup %1306 }
 0x3d1   :  { %v514_v53 = vpack.c.bf16 %v1307_v52, %v1305_v51 }
 0x3d3   :  { %1228 = vmatmul.mubr.bf16.vlgmr.msra.gmra.mrb[8].mxu0 %v514_v53 }
 0x3d4   :  { %1267 = vmatprep.mubr.msk.bf16.mxu0 %vm1414_vm0, %v1413_v0  ;;  %1252 = vmatpush3.bf16.msra.mxu0 %v1042_v63  ;;  %v869_v63 = vld [vmem:[#allocation5 + $0x1fc] sm:$0xf] }
 0x3d5   :  { %1253 = vmatprep.subr.bf16.mxu0 %v1413_v0  ;;  %v1058_v1 = vcombine.low %v868_v62, %v869_v63 }
 0x3d8   :  { %1254 = vmatpush3.bf16.msra.mxu0 %v1043_v2  ;;  %v1041_v2 = vld [vmem:[#allocation7 + $0x6] ss:$0 sm:$0xff] }
 0x3d9   :  { %1255 = vmatprep.subr.bf16.mxu0 %v1413_v0 }
 0x3dc   :  { %1256 = vmatpush3.bf16.msra.mxu0 %v1044_v5 }
 0x3dd   :  { %1257 = vmatprep.subr.bf16.mxu0 %v1413_v0 }
 0x3e0   :  { %1258 = vmatpush3.bf16.msra.mxu0 %v1045_v8 }
 0x3e1   :  { %1259 = vmatprep.subr.bf16.mxu0 %v1413_v0 }
 0x3e4   :  { %1260 = vmatpush3.bf16.msra.mxu0 %v1046_v11 }
 0x3e5   :  { %1261 = vmatprep.subr.bf16.mxu0 %v1413_v0 }
 0x3e8   :  { %1262 = vmatpush3.bf16.msra.mxu0 %v1047_v14 }
 0x3e9   :  { %1263 = vmatprep.subr.bf16.mxu0 %v1413_v0 }
 0x3ec   :  { %1264 = vmatpush3.bf16.msra.mxu0 %v1048_v27 }
 0x3ed   :  { %1265 = vmatprep.subr.bf16.mxu0 %v1413_v0 }
 0x3f0   :  { %1266 = vmatpush3.bf16.msra.mxu0 %v1049_v30 }
 0x4a6   :  { %v618_v16 = vpop.f32.mrb[8].mxu0 }
 0x4a7   :  { %v619_v17 = vadd.f32 %v1023_v15, %v618_v16  ;;  %v1229_v18 = vpop.f32.mrb[9].mxu0 }
 0x4a8   :  { %v621_v19 = vpop.f32.mrb[10].mxu0 }
 0x4a9   :  { %v622_v20 = vadd.f32 %v1023_v15, %v621_v19  ;;  %v1230_v21 = vpop.f32.mrb[11].mxu0  ;;  %v625_v22 = vmax.f32 %v619_v17, 0.0 }
 0x4ab   :  { %v626_v23 = vmax.f32 %v622_v20, 0.0 }
 0x4ad   :  { %v627_v24 = vpack.c.bf16 %v626_v23, %v625_v22 }
 0x4af   :  { %1248 = vmatmul.mubr.bf16.vlgmr.msra.gmra.mrb[8].mxu1 %v627_v24 }
 0x4b0   :  { %1287 = vmatprep.mubr.msk.bf16.mxu1 %vm1414_vm0, %v1413_v0  ;;  %1272 = vmatpush3.bf16.msra.mxu1 %v1051_v34 }
 0x4b1   :  { %1273 = vmatprep.subr.bf16.mxu1 %v1413_v0 }
 0x4b4   :  { %1274 = vmatpush3.bf16.msra.mxu1 %v1052_v36 }
 0x4b5   :  { %1275 = vmatprep.subr.bf16.mxu1 %v1413_v0 }
 0x4b8   :  { %1276 = vmatpush3.bf16.msra.mxu1 %v1053_v39 }
 0x4b9   :  { %1277 = vmatprep.subr.bf16.mxu1 %v1413_v0 }
 0x4bc   :  { %1278 = vmatpush3.bf16.msra.mxu1 %v1054_v42 }
 0x4bd   :  { %1279 = vmatprep.subr.bf16.mxu1 %v1413_v0 }
 0x4c0   :  { %1280 = vmatpush3.bf16.msra.mxu1 %v1055_v45 }
 0x4c1   :  { %1281 = vmatprep.subr.bf16.mxu1 %v1413_v0 }
 0x4c4   :  { %1282 = vmatpush3.bf16.msra.mxu1 %v1056_v48 }
 0x4c5   :  { %1283 = vmatprep.subr.bf16.mxu1 %v1413_v0 }
 0x4c8   :  { %1284 = vmatpush3.bf16.msra.mxu1 %v1057_v61 }
 0x4c9   :  { %1285 = vmatprep.subr.bf16.mxu1 %v1413_v0 }
 0x4cc   :  { %1286 = vmatpush3.bf16.msra.mxu1 %v1058_v1 }
 0x582   :  { %v731_v50 = vpop.f32.mrb[8].mxu1 }
 0x583   :  { %v732_v51 = vadd.f32 %v1032_v49, %v731_v50  ;;  %v1249_v52 = vpop.f32.mrb[9].mxu1 }
 0x584   :  { %v734_v53 = vpop.f32.mrb[10].mxu1 }
 0x585   :  { %v735_v54 = vadd.f32 %v1032_v49, %v734_v53  ;;  %v1250_v55 = vpop.f32.mrb[11].mxu1  ;;  %v738_v56 = vmax.f32 %v732_v51, 0.0 }
 0x587   :  { %v739_v57 = vmax.f32 %v735_v54, 0.0 }
 0x589   :  { %v740_v58 = vpack.c.bf16 %v739_v57, %v738_v56 }
 0x58b   :  { %1268 = vmatmul.mubr.bf16.vlgmr.msra.gmra.mrb[12].mxu0 %v740_v58 }
 0x65e   :  { %v844_v3 = vpop.f32.mrb[12].mxu0 }
 0x65f   :  { %v845_v4 = vadd.f32 %v1041_v2, %v844_v3  ;;  %v1269_v5 = vpop.f32.mrb[13].mxu0 }
 0x660   :  { %v847_v6 = vpop.f32.mrb[14].mxu0 }
 0x661   :  { %v848_v7 = vadd.f32 %v1041_v2, %v847_v6  ;;  %v1270_v8 = vpop.f32.mrb[15].mxu0  ;;  %v851_v9 = vmax.f32 %v845_v4, 0.0 }
 0x663   :  { %v852_v10 = vmax.f32 %v848_v7, 0.0 }
 0x665   :  { %v853_v11 = vpack.c.bf16 %v852_v10, %v851_v9 }
 0x667   :  { %1288 = vmatmul.mubr.bf16.vlgmr.msra.gmra.mrb[12].mxu1 %v853_v11 }
 0x73a   :  { %v957_v13 = vpop.f32.mrb[12].mxu1 }
 0x73b   :  { %v958_v14 = vadd.f32 %v1050_v12, %v957_v13  ;;  %v1289_v15 = vpop.f32.mrb[13].mxu1 }
 0x73c   :  { %v960_v0 = vpop.f32.mrb[14].mxu1 }
 0x73d   :  { %1308 = vtanh.f32 %v958_v14  ;;  %v961_v16 = vadd.f32 %v1050_v12, %v960_v0  ;;  %v1290_v17 = vpop.f32.mrb[15].mxu1 }
 0x73f   :  { %1310 = vtanh.f32 %v961_v16 }
 0x747   :  { %v1309_v18 = vpop.eup %1308 }
 0x748   :  { %966 = vst [vmem:[#allocation8] sm:$0xff] %v1309_v18 }
 0x749   :  { %v1311_v19 = vpop.eup %1310 }
 0x74a   :  { %967 = vst [vmem:[#allocation8 + $0x8] sm:$0xff] %v1311_v19 }
 0x74b   :  { %1389 = shalt.err (!%p1386_p0)
}
 0x74c   :  { %s1390_s27 = scalar_lea.hbm %s1569_s3, 256 }
 0x74d   :  { %p1391_p1 = scmp.ne.s32.totalorder %s1569_s3, %s1390_s27  ;;  %p1394_p2 = scmp.lt.u32.totalorder %s1390_s27, %s1569_s3 }
 0x74f   :  { %p1396_p3 = pnand %p1394_p2, %p1391_p1 }
 0x751   :  { %1399 = shalt.err (!%p1396_p3)
}
 0x752   :  { %s1416_s5 = smov 128   ;;  %s1417_s6 = smov 8  }
 0x753   :  { %979 = dma.vmem_to_hbm [thread:$0]  %s974_s23, 256, %s1569_s3, [#allocation4], %s1416_s5, %s1416_s5, %s1417_s6  }
 0x754   :  { %1404 = dma.done.wait [#allocation4], 256  }
 0x755   :  { %1405 = vsyncadd [#allocation4], 4294967040 }
 0x756   :  { %983 = vsyncpa [#allocation3], 1 }
 0x757   :  { %984 = vsyncpa [#allocation6], 1 }
 0x758   :  { %985 = vsyncpa [#allocation4], 1 }

</bundles_post_ra>
